<compile_context>
chip_gen: v5e
topology: v5e:2x2
jax: 0.10.0
libtpu: 0.0.40
codegen_flags: <defaults>
</compile_context>

<pallas_src>
import math
import functools

import jax
import jax.numpy as jnp
from jax import lax
from jax.experimental import pallas as pl
from jax.experimental.pallas import tpu as pltpu


def _hash32(x):
    """lowbias32 (Chris Wellons): 32-bit avalanche hash, constant shifts only."""
    x = x ^ (x >> 16)
    x = x * jnp.uint32(0x7FEB352D)
    x = x ^ (x >> 15)
    x = x * jnp.uint32(0x846CA68B)
    x = x ^ (x >> 16)
    return x


def _pe_dropout_kernel(train, p, batch, seq_tile, seed_ref, x_ref, pe_ref, o_ref):
    """x_ref/o_ref: (ts, B*D) lane-dense slab; pe_ref: (ts, D)."""
    ts, n = x_ref.shape

    # Column c = b*D + d, so broadcasting pe over the batch == B concatenated
    # copies of the pe row along the lane axis.
    y = x_ref[...] + jnp.tile(pe_ref[...], (1, batch)).astype(x_ref.dtype)

    if train and p > 0.0:
        if p >= 1.0:
            # Degenerate case: drop everything (avoids threshold wrap-around).
            y = jnp.zeros_like(y)
        else:
            # Counter-based hash PRNG: unique element id -> hash -> uniform.
            # Pure integer VPU ops, lowers under Mosaic AND interpret mode.
            row = lax.broadcasted_iota(jnp.int32, (ts, n), 0).astype(jnp.uint32)
            col = lax.broadcasted_iota(jnp.int32, (ts, n), 1).astype(jnp.uint32)
            tile_base = (pl.program_id(0) * seq_tile).astype(jnp.uint32)
            elem = (tile_base + row) * jnp.uint32(n) + col
            seed = seed_ref[0].astype(jnp.uint32)
            bits = _hash32(elem + seed * jnp.uint32(0x9E3779B9))
            # Compare in 24-bit signed-int space (safe lowering everywhere).
            h24 = (bits >> 8).astype(jnp.int32)
            thr = jnp.int32(min(int(round(p * (1 << 24))), 1 << 24))
            keep = h24 >= thr  # P(drop) ~= p
            y = jnp.where(keep, y * (1.0 / (1.0 - p)), jnp.zeros_like(y))

    o_ref[...] = y.astype(o_ref.dtype)


def _pick_seq_tile(S, row_bytes, target_bytes=2 * 1024 * 1024):
    """~2 MiB tiles; full extent if S is small; sublane-aligned otherwise."""
    ts = max(1, target_bytes // max(row_bytes, 1))
    if ts >= S:
        return S                      # one tile == full extent (always legal)
    ts = max(8, (ts // 8) * 8)        # keep second-to-last block dim % 8 == 0
    return min(ts, S)


class PositionalEncodingLayer:
    """JAX/Pallas port of the PyTorch PositionalEncodingLayer."""

    def __init__(self, d_model, dropout=0.1, max_len=5000):
        self.p = float(dropout)
        self.d_model = int(d_model)
        # Deterministic buffer init, identical math to the PyTorch code.
        position = jnp.arange(max_len, dtype=jnp.float32)[:, None]
        div_term = jnp.exp(
            jnp.arange(0, d_model, 2, dtype=jnp.float32)
            * (-math.log(10000.0) / d_model)
        )
        pe = jnp.zeros((max_len, d_model), dtype=jnp.float32)
        pe = pe.at[:, 0::2].set(jnp.sin(position * div_term))
        pe = pe.at[:, 1::2].set(jnp.cos(position * div_term))
        self.pe = pe  # (max_len, d_model); torch buffer is pe[:, None, :]

    def __call__(self, x, *, train=False, seed=0):
        S, B, D = x.shape
        assert D == self.d_model
        n_cols = B * D

        # Lane/sublane-dense 2-D slab (free reshape in seq-first layout).
        x2 = x.reshape(S, n_cols)
        pe2 = self.pe[:S].astype(x.dtype)          # (S, D), matches x dtype

        row_bytes = n_cols * jnp.dtype(x.dtype).itemsize
        ts = _pick_seq_tile(S, row_bytes)
        grid = (pl.cdiv(S, ts),)                    # ragged tail handled by Pallas

        kernel = functools.partial(_pe_dropout_kernel, bool(train), self.p, B, ts)
        seed_arr = jnp.array([seed], dtype=jnp.int32)

        out2 = pl.pallas_call(
            kernel,
            out_shape=jax.ShapeDtypeStruct((S, n_cols), x.dtype),
            grid_spec=pltpu.PrefetchScalarGridSpec(
                num_scalar_prefetch=1,
                grid=grid,
                in_specs=[
                    pl.BlockSpec((ts, n_cols), lambda i, seed_ref: (i, 0)),
                    pl.BlockSpec((ts, D), lambda i, seed_ref: (i, 0)),
                ],
                out_specs=pl.BlockSpec((ts, n_cols), lambda i, seed_ref: (i, 0)),
            ),
            compiler_params=pltpu.CompilerParams(
                # No cross-iteration dependency: lets v7x split across 2 TCs.
                dimension_semantics=("parallel",),
            ),
        )(seed_arr, x2, pe2)

        return out2.reshape(S, B, D)


if __name__ == "__main__":
    key = jax.random.PRNGKey(0)
    S, B, D = 8, 2, 32  # (seq, batch, d_model)
    x = jax.random.normal(key, (S, B, D), dtype=jnp.float32)

    layer = PositionalEncodingLayer(d_model=D, dropout=0.1, max_len=64)

    # Eval mode (dropout = identity): exact check against pure-JAX reference.
    out_eval = layer(x, train=False)
    jax.block_until_ready(out_eval)
    ref = x + layer.pe[:S][:, None, :]
    assert out_eval.shape == (S, B, D)
    assert jnp.allclose(out_eval, ref, atol=1e-6), "eval-mode mismatch"

    # Train mode: every element must be either 0 (dropped) or (x+pe)/(1-p).
    out_train = layer(x, train=True, seed=1234)
    jax.block_until_ready(out_train)
    scaled = ref / (1.0 - layer.p)
    ok = jnp.isclose(out_train, 0.0, atol=1e-6) | jnp.isclose(
        out_train, scaled, atol=1e-5, rtol=1e-5
    )
    assert bool(jnp.all(ok)), "train-mode values not in {0, scaled}"

    print("KERNEL_OK")
</pallas_src>

<mosaic_0001>
module attributes {stable_mosaic.version = 11 : i64} {
  func.func @_pe_dropout_kernel(%arg0: i32, %arg1: memref<1xi32, #tpu.memory_space<smem>>, %arg2: memref<8x64xf32, #tpu.memory_space<vmem>>, %arg3: memref<8x32xf32, #tpu.memory_space<vmem>>, %arg4: memref<8x64xf32, #tpu.memory_space<vmem>>) attributes {dimension_semantics = [#tpu.dimension_semantics<parallel>], iteration_bounds = array<i64: 1>, scalar_prefetch = 1 : i64, scratch_operands = 0 : i64, tpu.core_type = #tpu.core_type<tc>, window_params = [{transform_indices = @transform_0, window_bounds = array<i64: 8, 64>}, {transform_indices = @transform_1, window_bounds = array<i64: 8, 32>}, {transform_indices = @transform_2, window_bounds = array<i64: 8, 64>}]} {
    %c0 = arith.constant 0 : index
    %c0_0 = arith.constant 0 : index
    %0 = vector.load %arg2[%c0, %c0_0] : memref<8x64xf32, #tpu.memory_space<vmem>>, vector<8x64xf32>
    %c0_1 = arith.constant 0 : index
    %c0_2 = arith.constant 0 : index
    %1 = vector.load %arg3[%c0_1, %c0_2] : memref<8x32xf32, #tpu.memory_space<vmem>>, vector<8x32xf32>
    %2 = tpu.concatenate %1, %1 in 1 : vector<8x32xf32>, vector<8x32xf32> -> vector<8x64xf32>
    %3 = arith.addf %0, %2 : vector<8x64xf32>
    %c0_3 = arith.constant 0 : index
    %c0_4 = arith.constant 0 : index
    %4 = vector.load %arg4[%c0_3, %c0_4] : memref<8x64xf32, #tpu.memory_space<vmem>>, vector<8x64xf32>
    tpu.vector_store %arg4[%c0_3, %c0_4], %3 {strides = array<i32>} : memref<8x64xf32, #tpu.memory_space<vmem>>, vector<8x64xf32>,
    return
  }
  func.func @transform_0(%arg0: i32, %arg1: memref<1xi32, #tpu.memory_space<smem>>) -> (i32, i32) {
    %c0_i32 = arith.constant 0 : i32
    %c0_i32_0 = arith.constant 0 : i32
    return %arg0, %c0_i32 : i32, i32
  }
  func.func @transform_1(%arg0: i32, %arg1: memref<1xi32, #tpu.memory_space<smem>>) -> (i32, i32) {
    %c0_i32 = arith.constant 0 : i32
    %c0_i32_0 = arith.constant 0 : i32
    return %arg0, %c0_i32 : i32, i32
  }
  func.func @transform_2(%arg0: i32, %arg1: memref<1xi32, #tpu.memory_space<smem>>) -> (i32, i32) {
    %c0_i32 = arith.constant 0 : i32
    %c0_i32_0 = arith.constant 0 : i32
    return %arg0, %c0_i32 : i32, i32
  }
}

</mosaic_0001>

<bundles_post_ra>
// kernel: tpu_custom_call.1
= control target key start
LH: loop header
LB: loop body
LE: loop exit
PB: predicated region body
PF: predicated region fallthrough
CT: control target
= control target key end

     0   :  { %9 = vsyncpa [#allocation5], 0  ;;  %s186_s0 = inlined_call_operand.<no memory space> [shape: s32[1], index: 0, kind: input, shape index: {}]   ;;  %s187_s1 = inlined_call_operand.hbm [shape: f32[8,64], index: 1, kind: input, shape index: {}]   ;;  %s188_s2 = inlined_call_operand.hbm [shape: f32[8,32], index: 2, kind: input, shape index: {}]   ;;  %s189_s3 = inlined_call_operand.hbm [shape: f32[8,64], index: 3, kind: output, shape index: {}]  }
   0x1   :  { %10 = vsyncpa [#allocation8], 0 }
   0x2   :  { %11 = vsyncpa [#allocation6], 0  ;;  %s17_s14 = sshll.u32 %s187_s1, 4  ;;  %s153_s15 = smov [#allocation4]   ;;  %s18_s14 = int_to_ptr.hbm [resolvable:$true] %s17_s14 }
   0x3   :  { %s19_s16 = sshll.u32 %s153_s15, 4  ;;  %s28_s18 = sshll.u32 %s188_s2, 4  ;;  %s20_s16 = int_to_ptr.vmem [resolvable:$true] %s19_s16  ;;  %s29_s18 = int_to_ptr.hbm [resolvable:$true] %s28_s18 }
   0x4   :  { %22 = dma.hbm_to_vmem [thread:$0]  %s18_s14, 128, %s20_s16, [#allocation5]  }
   0x5   :  { %s154_s19 = smov [#allocation7]  }
   0x6   :  { %s30_s20 = sshll.u32 %s154_s19, 4  ;;  %s31_s20 = int_to_ptr.vmem [resolvable:$true] %s30_s20 }
   0x7   :  { %33 = dma.hbm_to_vmem [thread:$0]  %s29_s18, 128, %s31_s20, [#allocation8]  }
   0x8   :  { %147 = dma.done.wait [#allocation5], 128  }
   0x9   :  { %148 = vsyncadd [#allocation5], 4294967168 }
   0xa   :  { %149 = dma.done.wait [#allocation8], 128  }
   0xb   :  { %150 = vsyncadd [#allocation8], 4294967168  ;;  %v43_v0 = vld [vmem:[#allocation7] sm:$0xff]  ;;  %s155_s1 = smov 32   ;;  %vm48_vm0 = vcmask 261120   ;;  %v42_v1 = vld [vmem:[#allocation4] sm:$0xff] }
   0xc   :  { %45 = vrot.lane.b32.xlu0 %v43_v0, %s155_s1  ;;  %s156_s21 = smov [#allocation9]   ;;  %s60_s2 = sshll.u32 %s189_s3, 4  ;;  %vm51_vm1 = vcmask 523264   ;;  %s61_s2 = int_to_ptr.hbm [resolvable:$true] %s60_s2 }
   0xd   :  { %s58_s22 = sshll.u32 %s156_s21, 4  ;;  %s59_s22 = int_to_ptr.vmem [resolvable:$true] %s58_s22 }
  0x7e   :  { %v46_v2 = vpop.permute.xlu0 %45 }
  0x7f   :  { %v49_v3 = vsel %vm48_vm0, %v43_v0, %v46_v2 }
  0x80   :  { %v50_v4 = vadd.f32 %v49_v3, %v42_v1 }
  0x82   :  { %52 = vst.msk [vmem:[#allocation9] sm:$0xff] %vm51_vm1, %v50_v4 }
  0x83   :  { %63 = dma.vmem_to_hbm [thread:$0]  %s59_s22, 128, %s61_s2, [#allocation6]  }
  0x84   :  { %151 = dma.done.wait [#allocation6], 128  }
  0x85   :  { %152 = vsyncadd [#allocation6], 4294967168 }
  0x86   :  { %68 = vsyncpa [#allocation5], 1 }
  0x87   :  { %69 = vsyncpa [#allocation8], 1 }
  0x88   :  { %70 = vsyncpa [#allocation6], 1 }

</bundles_post_ra>
